<compile_context>
chip_gen: v5e
topology: v5e:2x2
jax: 0.10.0
libtpu: 0.0.40
codegen_flags: <defaults>
</compile_context>

<pallas_src>
import functools

import jax
import jax.numpy as jnp
from jax.experimental import pallas as pl
from jax.experimental.pallas import tpu as pltpu

HIDDEN = 256
LEAKY_SLOPE = 0.01           # PyTorch nn.LeakyReLU default negative_slope
MAX_BATCH_TILE = 512         # <=512 keeps 2-deep buffering comfortable on v7x


def _round_up(n, m):
    return ((n + m - 1) // m) * m


def _leaky_relu(x):
    return jnp.where(x > 0, x, LEAKY_SLOPE * x)


def generator_kernel(x_ref, c_ref, w1x_ref, w1c_ref, b1_ref,
                     w2_ref, b2_ref, w3_ref, b3_ref, w4_ref, b4_ref, out_ref):
    """4-layer MLP on one (TB, ...) batch tile; weights are VMEM-resident."""
    # layer 1: fused concat -> linear   (X @ W1[:z] + C @ W1[z:] + b1)
    h = (jnp.dot(x_ref[...], w1x_ref[...], preferred_element_type=jnp.float32)
         + jnp.dot(c_ref[...], w1c_ref[...], preferred_element_type=jnp.float32)
         + b1_ref[...])
    h = _leaky_relu(h)

    h = jnp.dot(h.astype(jnp.bfloat16), w2_ref[...],
                preferred_element_type=jnp.float32) + b2_ref[...]
    h = _leaky_relu(h)

    h = jnp.dot(h.astype(jnp.bfloat16), w3_ref[...],
                preferred_element_type=jnp.float32) + b3_ref[...]
    h = _leaky_relu(h)

    h = jnp.dot(h.astype(jnp.bfloat16), w4_ref[...],
                preferred_element_type=jnp.float32) + b4_ref[...]
    out_ref[...] = jnp.tanh(h)


def init_generator_params(key, z_dim, data_dim, c_dim):
    """PyTorch-style uniform fan-in init, stored as [in_features, out_features]."""
    dims = [z_dim + c_dim, HIDDEN, HIDDEN, HIDDEN, data_dim]
    params = {}
    for i in range(4):
        fan_in, fan_out = dims[i], dims[i + 1]
        key, kw, kb = jax.random.split(key, 3)
        bound = 1.0 / float(fan_in) ** 0.5
        params[f"w{i + 1}"] = jax.random.uniform(
            kw, (fan_in, fan_out), jnp.float32, -bound, bound)
        params[f"b{i + 1}"] = jax.random.uniform(
            kb, (fan_out,), jnp.float32, -bound, bound)
    return params


def pack_generator_params(params, z_dim, data_dim, c_dim):
    """One-time packing: split W1, pad W4/b4 lanes to 128, bf16 MXU weights."""
    del c_dim  # implied by w1's row count
    d_out_pad = _round_up(data_dim, 128)
    w4 = jnp.zeros((HIDDEN, d_out_pad), jnp.float32).at[:, :data_dim].set(params["w4"])
    b4 = jnp.zeros((1, d_out_pad), jnp.float32).at[:, :data_dim].set(
        params["b4"].reshape(1, -1))
    return {
        "w1x": params["w1"][:z_dim].astype(jnp.bfloat16),
        "w1c": params["w1"][z_dim:].astype(jnp.bfloat16),
        "b1": params["b1"].reshape(1, HIDDEN),
        "w2": params["w2"].astype(jnp.bfloat16),
        "b2": params["b2"].reshape(1, HIDDEN),
        "w3": params["w3"].astype(jnp.bfloat16),
        "b3": params["b3"].reshape(1, HIDDEN),
        "w4": w4.astype(jnp.bfloat16),
        "b4": b4,                                  # f32, added to f32 accumulator
    }


@functools.partial(jax.jit, static_argnames=("z_dim", "data_dim", "c_dim"))
def generator_forward(X, C, packed, *, z_dim, data_dim, c_dim):
    assert X.shape[1] == z_dim
    assert C.shape[1] == c_dim
    B = X.shape[0]
    d_out_pad = _round_up(data_dim, 128)

    # Batch tile: multiple of 8, capped for v7x VMEM; large batches get 512
    # (a multiple of 256, filling the 256-row MXU on v6e/v7x).
    TB = MAX_BATCH_TILE if B >= MAX_BATCH_TILE else _round_up(B, 8)
    B_pad = _round_up(B, TB)
    grid = (B_pad // TB,)

    x = X.astype(jnp.bfloat16)
    c = C.astype(jnp.bfloat16)
    if B_pad != B:
        x = jnp.zeros((B_pad, z_dim), jnp.bfloat16).at[:B].set(x)
        c = jnp.zeros((B_pad, c_dim), jnp.bfloat16).at[:B].set(c)

    def act_spec(d):                      # batch-tiled activations
        return pl.BlockSpec((TB, d), lambda i: (i, 0))

    def res_spec(shape):                  # grid-resident parameters (no re-DMA)
        return pl.BlockSpec(shape, lambda i: (0, 0))

    flops = 2 * B_pad * (z_dim * HIDDEN + c_dim * HIDDEN
                         + 2 * HIDDEN * HIDDEN + HIDDEN * d_out_pad)
    bytes_accessed = (
        B_pad * (z_dim + c_dim) * 2                      # bf16 activations in
        + B_pad * d_out_pad * 4                          # f32 output
        + 2 * ((z_dim + c_dim) * HIDDEN + 2 * HIDDEN * HIDDEN
               + HIDDEN * d_out_pad)                     # bf16 weights
        + 4 * (3 * HIDDEN + d_out_pad))                  # f32 biases

    out = pl.pallas_call(
        generator_kernel,
        out_shape=jax.ShapeDtypeStruct((B_pad, d_out_pad), jnp.float32),
        grid=grid,
        in_specs=[
            act_spec(z_dim),                  # X tile
            act_spec(c_dim),                  # C tile
            res_spec((z_dim, HIDDEN)),        # W1[:z]
            res_spec((c_dim, HIDDEN)),        # W1[z:]
            res_spec((1, HIDDEN)),            # b1
            res_spec((HIDDEN, HIDDEN)),       # W2
            res_spec((1, HIDDEN)),            # b2
            res_spec((HIDDEN, HIDDEN)),       # W3
            res_spec((1, HIDDEN)),            # b3
            res_spec((HIDDEN, d_out_pad)),    # W4 (cols zero-padded)
            res_spec((1, d_out_pad)),         # b4 (cols zero-padded)
        ],
        out_specs=pl.BlockSpec((TB, d_out_pad), lambda i: (i, 0)),
        compiler_params=pltpu.CompilerParams(
            dimension_semantics=("parallel",)),
        cost_estimate=pl.CostEstimate(
            flops=flops,
            transcendentals=B_pad * d_out_pad,
            bytes_accessed=bytes_accessed),
    )(x, c, packed["w1x"], packed["w1c"], packed["b1"],
      packed["w2"], packed["b2"], packed["w3"], packed["b3"],
      packed["w4"], packed["b4"])

    return out[:B, :data_dim]


def generator_forward_ref(X, C, params):
    """Pure-JAX f32 reference (semantics of the PyTorch module)."""
    h = jnp.concatenate([X, C], axis=1).astype(jnp.float32)
    for i in range(1, 4):
        h = h @ params[f"w{i}"] + params[f"b{i}"]
        h = jnp.where(h > 0, h, LEAKY_SLOPE * h)
    h = h @ params["w4"] + params["b4"]
    return jnp.tanh(h)


if __name__ == "__main__":
    z_dim, c_dim, data_dim, batch = 16, 8, 64, 8

    key = jax.random.PRNGKey(0)
    k_params, k_x, k_c = jax.random.split(key, 3)

    params = init_generator_params(k_params, z_dim, data_dim, c_dim)
    packed = pack_generator_params(params, z_dim, data_dim, c_dim)

    X = jax.random.normal(k_x, (batch, z_dim), jnp.float32)
    C = jax.random.normal(k_c, (batch, c_dim), jnp.float32)

    out = generator_forward(X, C, packed, z_dim=z_dim, data_dim=data_dim,
                            c_dim=c_dim)
    out = jax.block_until_ready(out)

    ref = generator_forward_ref(X, C, params)
    assert out.shape == (batch, data_dim)
    # bf16 MXU inputs with f32 accumulation -> tolerance looser than pure f32.
    max_diff = float(jnp.max(jnp.abs(out - ref)))
    assert jnp.allclose(out, ref, atol=2e-2, rtol=2e-2), (
        f"mismatch vs reference: max |diff| = {max_diff}")

    print("KERNEL_OK")
</pallas_src>

<mosaic_0001>
module attributes {stable_mosaic.version = 11 : i64} {
  func.func @generator_kernel(%arg0: i32, %arg1: memref<8x16xbf16, #tpu.memory_space<vmem>>, %arg2: memref<8x8xbf16, #tpu.memory_space<vmem>>, %arg3: memref<16x256xbf16, #tpu.memory_space<vmem>>, %arg4: memref<8x256xbf16, #tpu.memory_space<vmem>>, %arg5: memref<1x256xf32, #tpu.memory_space<vmem>>, %arg6: memref<256x256xbf16, #tpu.memory_space<vmem>>, %arg7: memref<1x256xf32, #tpu.memory_space<vmem>>, %arg8: memref<256x256xbf16, #tpu.memory_space<vmem>>, %arg9: memref<1x256xf32, #tpu.memory_space<vmem>>, %arg10: memref<256x128xbf16, #tpu.memory_space<vmem>>, %arg11: memref<1x128xf32, #tpu.memory_space<vmem>>, %arg12: memref<8x128xf32, #tpu.memory_space<vmem>>) attributes {dimension_semantics = [#tpu.dimension_semantics<parallel>], iteration_bounds = array<i64: 1>, scalar_prefetch = 0 : i64, scratch_operands = 0 : i64, tpu.core_type = #tpu.core_type<tc>, window_params = [{transform_indices = @transform_0, window_bounds = array<i64: 8, 16>}, {transform_indices = @transform_1, window_bounds = array<i64: 8, 8>}, {pipeline_mode = #tpu.pipeline_mode<synchronous>, transform_indices = @transform_2, window_bounds = array<i64: 16, 256>}, {pipeline_mode = #tpu.pipeline_mode<synchronous>, transform_indices = @transform_3, window_bounds = array<i64: 8, 256>}, {pipeline_mode = #tpu.pipeline_mode<synchronous>, transform_indices = @transform_4, window_bounds = array<i64: 1, 256>}, {pipeline_mode = #tpu.pipeline_mode<synchronous>, transform_indices = @transform_5, window_bounds = array<i64: 256, 256>}, {pipeline_mode = #tpu.pipeline_mode<synchronous>, transform_indices = @transform_6, window_bounds = array<i64: 1, 256>}, {pipeline_mode = #tpu.pipeline_mode<synchronous>, transform_indices = @transform_7, window_bounds = array<i64: 256, 256>}, {pipeline_mode = #tpu.pipeline_mode<synchronous>, transform_indices = @transform_8, window_bounds = array<i64: 1, 256>}, {pipeline_mode = #tpu.pipeline_mode<synchronous>, transform_indices = @transform_9, window_bounds = array<i64: 256, 128>}, {pipeline_mode = #tpu.pipeline_mode<synchronous>, transform_indices = @transform_10, window_bounds = array<i64: 1, 128>}, {transform_indices = @transform_11, window_bounds = array<i64: 8, 128>}]} {
    %c0 = arith.constant 0 : index
    %c0_0 = arith.constant 0 : index
    %0 = vector.load %arg1[%c0, %c0_0] : memref<8x16xbf16, #tpu.memory_space<vmem>>, vector<8x16xbf16>
    %c0_1 = arith.constant 0 : index
    %c0_2 = arith.constant 0 : index
    %1 = vector.load %arg3[%c0_1, %c0_2] : memref<16x256xbf16, #tpu.memory_space<vmem>>, vector<16x256xbf16>
    %cst = arith.constant dense<0.000000e+00> : vector<8x256xf32>
    %2 = tpu.matmul %0, %1, %cst {dimension_numbers = #tpu.dot_dimension_numbers<[1], [0], [0], [1], [0, 0, 1, 1], [], []>} : vector<8x16xbf16>, vector<16x256xbf16>, vector<8x256xf32> -> vector<8x256xf32>
    %c0_3 = arith.constant 0 : index
    %c0_4 = arith.constant 0 : index
    %3 = vector.load %arg2[%c0_3, %c0_4] : memref<8x8xbf16, #tpu.memory_space<vmem>>, vector<8x8xbf16>
    %c0_5 = arith.constant 0 : index
    %c0_6 = arith.constant 0 : index
    %4 = vector.load %arg4[%c0_5, %c0_6] : memref<8x256xbf16, #tpu.memory_space<vmem>>, vector<8x256xbf16>
    %cst_7 = arith.constant dense<0.000000e+00> : vector<8x256xf32>
    %5 = tpu.matmul %3, %4, %cst_7 {dimension_numbers = #tpu.dot_dimension_numbers<[1], [0], [0], [1], [0, 0, 1, 1], [], []>} : vector<8x8xbf16>, vector<8x256xbf16>, vector<8x256xf32> -> vector<8x256xf32>
    %6 = arith.addf %2, %5 : vector<8x256xf32>
    %c0_8 = arith.constant 0 : index
    %c0_9 = arith.constant 0 : index
    %7 = vector.load %arg5[%c0_8, %c0_9] : memref<1x256xf32, #tpu.memory_space<vmem>>, vector<1x256xf32>
    %8 = vector.broadcast %7 : vector<1x256xf32> to vector<8x256xf32>
    %9 = arith.addf %6, %8 : vector<8x256xf32>
    %cst_10 = arith.constant 0.000000e+00 : f32
    %10 = vector.broadcast %cst_10 : f32 to vector<8x256xf32>
    %11 = arith.cmpf ogt, %9, %10 : vector<8x256xf32>
    %cst_11 = arith.constant 0.00999999977 : f32
    %12 = vector.broadcast %cst_11 : f32 to vector<8x256xf32>
    %13 = arith.mulf %12, %9 : vector<8x256xf32>
    %14 = arith.select %11, %9, %13 : vector<8x256xi1>, vector<8x256xf32>
    %15 = arith.truncf %14 : vector<8x256xf32> to vector<8x256xbf16>
    %c0_12 = arith.constant 0 : index
    %c0_13 = arith.constant 0 : index
    %16 = vector.load %arg6[%c0_12, %c0_13] : memref<256x256xbf16, #tpu.memory_space<vmem>>, vector<256x256xbf16>
    %cst_14 = arith.constant dense<0.000000e+00> : vector<8x256xf32>
    %17 = tpu.matmul %15, %16, %cst_14 {dimension_numbers = #tpu.dot_dimension_numbers<[1], [0], [0], [1], [0, 0, 1, 1], [], []>} : vector<8x256xbf16>, vector<256x256xbf16>, vector<8x256xf32> -> vector<8x256xf32>
    %c0_15 = arith.constant 0 : index
    %c0_16 = arith.constant 0 : index
    %18 = vector.load %arg7[%c0_15, %c0_16] : memref<1x256xf32, #tpu.memory_space<vmem>>, vector<1x256xf32>
    %19 = vector.broadcast %18 : vector<1x256xf32> to vector<8x256xf32>
    %20 = arith.addf %17, %19 : vector<8x256xf32>
    %cst_17 = arith.constant 0.000000e+00 : f32
    %21 = vector.broadcast %cst_17 : f32 to vector<8x256xf32>
    %22 = arith.cmpf ogt, %20, %21 : vector<8x256xf32>
    %cst_18 = arith.constant 0.00999999977 : f32
    %23 = vector.broadcast %cst_18 : f32 to vector<8x256xf32>
    %24 = arith.mulf %23, %20 : vector<8x256xf32>
    %25 = arith.select %22, %20, %24 : vector<8x256xi1>, vector<8x256xf32>
    %26 = arith.truncf %25 : vector<8x256xf32> to vector<8x256xbf16>
    %c0_19 = arith.constant 0 : index
    %c0_20 = arith.constant 0 : index
    %27 = vector.load %arg8[%c0_19, %c0_20] : memref<256x256xbf16, #tpu.memory_space<vmem>>, vector<256x256xbf16>
    %cst_21 = arith.constant dense<0.000000e+00> : vector<8x256xf32>
    %28 = tpu.matmul %26, %27, %cst_21 {dimension_numbers = #tpu.dot_dimension_numbers<[1], [0], [0], [1], [0, 0, 1, 1], [], []>} : vector<8x256xbf16>, vector<256x256xbf16>, vector<8x256xf32> -> vector<8x256xf32>
    %c0_22 = arith.constant 0 : index
    %c0_23 = arith.constant 0 : index
    %29 = vector.load %arg9[%c0_22, %c0_23] : memref<1x256xf32, #tpu.memory_space<vmem>>, vector<1x256xf32>
    %30 = vector.broadcast %29 : vector<1x256xf32> to vector<8x256xf32>
    %31 = arith.addf %28, %30 : vector<8x256xf32>
    %cst_24 = arith.constant 0.000000e+00 : f32
    %32 = vector.broadcast %cst_24 : f32 to vector<8x256xf32>
    %33 = arith.cmpf ogt, %31, %32 : vector<8x256xf32>
    %cst_25 = arith.constant 0.00999999977 : f32
    %34 = vector.broadcast %cst_25 : f32 to vector<8x256xf32>
    %35 = arith.mulf %34, %31 : vector<8x256xf32>
    %36 = arith.select %33, %31, %35 : vector<8x256xi1>, vector<8x256xf32>
    %37 = arith.truncf %36 : vector<8x256xf32> to vector<8x256xbf16>
    %c0_26 = arith.constant 0 : index
    %c0_27 = arith.constant 0 : index
    %38 = vector.load %arg10[%c0_26, %c0_27] : memref<256x128xbf16, #tpu.memory_space<vmem>>, vector<256x128xbf16>
    %cst_28 = arith.constant dense<0.000000e+00> : vector<8x128xf32>
    %39 = tpu.matmul %37, %38, %cst_28 {dimension_numbers = #tpu.dot_dimension_numbers<[1], [0], [0], [1], [0, 0, 1, 1], [], []>} : vector<8x256xbf16>, vector<256x128xbf16>, vector<8x128xf32> -> vector<8x128xf32>
    %c0_29 = arith.constant 0 : index
    %c0_30 = arith.constant 0 : index
    %40 = vector.load %arg11[%c0_29, %c0_30] : memref<1x128xf32, #tpu.memory_space<vmem>>, vector<1x128xf32>
    %41 = vector.broadcast %40 : vector<1x128xf32> to vector<8x128xf32>
    %42 = arith.addf %39, %41 : vector<8x128xf32>
    %43 = math.tanh %42 : vector<8x128xf32>
    %c0_31 = arith.constant 0 : index
    %c0_32 = arith.constant 0 : index
    %44 = vector.load %arg12[%c0_31, %c0_32] : memref<8x128xf32, #tpu.memory_space<vmem>>, vector<8x128xf32>
    tpu.vector_store %arg12[%c0_31, %c0_32], %43 {strides = array<i32>} : memref<8x128xf32, #tpu.memory_space<vmem>>, vector<8x128xf32>,
    return
  }
  func.func @transform_0(%arg0: i32) -> (i32, i32) {
    %c0_i32 = arith.constant 0 : i32
    %c0_i32_0 = arith.constant 0 : i32
    return %arg0, %c0_i32 : i32, i32
  }
  func.func @transform_1(%arg0: i32) -> (i32, i32) {
    %c0_i32 = arith.constant 0 : i32
    %c0_i32_0 = arith.constant 0 : i32
    return %arg0, %c0_i32 : i32, i32
  }
  func.func @transform_2(%arg0: i32) -> (i32, i32) {
    %c0_i32 = arith.constant 0 : i32
    %c0_i32_0 = arith.constant 0 : i32
    %c0_i32_1 = arith.constant 0 : i32
    return %c0_i32, %c0_i32_0 : i32, i32
  }
  func.func @transform_3(%arg0: i32) -> (i32, i32) {
    %c0_i32 = arith.constant 0 : i32
    %c0_i32_0 = arith.constant 0 : i32
    %c0_i32_1 = arith.constant 0 : i32
    return %c0_i32, %c0_i32_0 : i32, i32
  }
  func.func @transform_4(%arg0: i32) -> (i32, i32) {
    %c0_i32 = arith.constant 0 : i32
    %c0_i32_0 = arith.constant 0 : i32
    %c0_i32_1 = arith.constant 0 : i32
    return %c0_i32, %c0_i32_0 : i32, i32
  }
  func.func @transform_5(%arg0: i32) -> (i32, i32) {
    %c0_i32 = arith.constant 0 : i32
    %c0_i32_0 = arith.constant 0 : i32
    %c0_i32_1 = arith.constant 0 : i32
    return %c0_i32, %c0_i32_0 : i32, i32
  }
  func.func @transform_6(%arg0: i32) -> (i32, i32) {
    %c0_i32 = arith.constant 0 : i32
    %c0_i32_0 = arith.constant 0 : i32
    %c0_i32_1 = arith.constant 0 : i32
    return %c0_i32, %c0_i32_0 : i32, i32
  }
  func.func @transform_7(%arg0: i32) -> (i32, i32) {
    %c0_i32 = arith.constant 0 : i32
    %c0_i32_0 = arith.constant 0 : i32
    %c0_i32_1 = arith.constant 0 : i32
    return %c0_i32, %c0_i32_0 : i32, i32
  }
  func.func @transform_8(%arg0: i32) -> (i32, i32) {
    %c0_i32 = arith.constant 0 : i32
    %c0_i32_0 = arith.constant 0 : i32
    %c0_i32_1 = arith.constant 0 : i32
    return %c0_i32, %c0_i32_0 : i32, i32
  }
  func.func @transform_9(%arg0: i32) -> (i32, i32) {
    %c0_i32 = arith.constant 0 : i32
    %c0_i32_0 = arith.constant 0 : i32
    %c0_i32_1 = arith.constant 0 : i32
    return %c0_i32, %c0_i32_0 : i32, i32
  }
  func.func @transform_10(%arg0: i32) -> (i32, i32) {
    %c0_i32 = arith.constant 0 : i32
    %c0_i32_0 = arith.constant 0 : i32
    %c0_i32_1 = arith.constant 0 : i32
    return %c0_i32, %c0_i32_0 : i32, i32
  }
  func.func @transform_11(%arg0: i32) -> (i32, i32) {
    %c0_i32 = arith.constant 0 : i32
    %c0_i32_0 = arith.constant 0 : i32
    return %arg0, %c0_i32 : i32, i32
  }
}

</mosaic_0001>

<bundles_post_ra>
// kernel: generator_forward.1
= control target key start
LH: loop header
LB: loop body
LE: loop exit
PB: predicated region body
PF: predicated region fallthrough
CT: control target
= control target key end

     0   :  { %16 = vsyncpa [#allocation3], 0  ;;  %s1577_s0 = inlined_call_operand.vmem [shape: bf16[8,16], index: 0, kind: input, shape index: {}]   ;;  %s1578_s1 = inlined_call_operand.vmem [shape: bf16[8,8], index: 1, kind: input, shape index: {}]   ;;  %s1579_s2 = inlined_call_operand.vmem [shape: bf16[16,256], index: 2, kind: input, shape index: {}]   ;;  %s1580_s3 = inlined_call_operand.vmem [shape: bf16[8,256], index: 3, kind: input, shape index: {}]   ;;  %s1581_s4 = inlined_call_operand.vmem [shape: f32[1,256], index: 4, kind: input, shape index: {}]   ;;  %s1582_s5 = inlined_call_operand.hbm [shape: bf16[256,256], index: 5, kind: input, shape index: {}]   ;;  %s1583_s6 = inlined_call_operand.vmem [shape: f32[1,256], index: 6, kind: input, shape index: {}]   ;;  %s1584_s7 = inlined_call_operand.hbm [shape: bf16[256,256], index: 7, kind: input, shape index: {}]   ;;  %s1585_s8 = inlined_call_operand.vmem [shape: f32[1,256], index: 8, kind: input, shape index: {}]   ;;  %s1586_s9 = inlined_call_operand.hbm [shape: bf16[256,128], index: 9, kind: input, shape index: {}]   ;;  %s1587_s10 = inlined_call_operand.hbm [shape: f32[1,128], index: 10, kind: input, shape index: {}]   ;;  %s1588_s11 = inlined_call_operand.hbm [shape: f32[8,128], index: 11, kind: output, shape index: {}]  }
   0x1   :  { %17 = vsyncpa [#allocation6], 0 }
   0x2   :  { %18 = vsyncpa [#allocation9], 0 }
   0x3   :  { %19 = vsyncpa [#allocation4], 0  ;;  %s49_s19 = sshll.u32 %s1584_s7, 4  ;;  %s1453_s20 = smov [#allocation5]   ;;  %s50_s19 = int_to_ptr.hbm [resolvable:$true] %s49_s19 }
   0x4   :  { %s51_s21 = sshll.u32 %s1453_s20, 4  ;;  %s34_s24 = sshll.u32 %s1582_s5, 4  ;;  %s52_s21 = int_to_ptr.vmem [resolvable:$true] %s51_s21  ;;  %s35_s24 = int_to_ptr.hbm [resolvable:$true] %s34_s24 }
   0x5   :  { %s1454_s25 = smov 128   ;;  %s1455_s26 = smov 8  }
   0x6   :  { %57 = dma.hbm_to_vmem [thread:$0]  %s50_s19, 4096, %s52_s21, [#allocation6], %s1454_s25, %s1454_s25, %s1455_s26  }
   0x7   :  { %s1456_s27 = smov [#allocation2]   ;;  %s64_s12 = sshll.u32 %s1586_s9, 4  ;;  %s65_s12 = int_to_ptr.hbm [resolvable:$true] %s64_s12 }
   0x8   :  { %s36_s28 = sshll.u32 %s1456_s27, 4  ;;  %s1457_s7 = smov [#allocation7]   ;;  %s37_s28 = int_to_ptr.vmem [resolvable:$true] %s36_s28 }
   0x9   :  { %42 = dma.hbm_to_vmem [thread:$0]  %s35_s24, 4096, %s37_s28, [#allocation3], %s1454_s25, %s1454_s25, %s1455_s26  }
   0xa   :  { %s66_s13 = sshll.u32 %s1457_s7, 4  ;;  %s78_s5 = sshll.u32 %s1587_s10, 4  ;;  %s67_s13 = int_to_ptr.vmem [resolvable:$true] %s66_s13  ;;  %s79_s5 = int_to_ptr.hbm [resolvable:$true] %s78_s5 }
   0xb   :  { %s1458_s16 = smov 64   ;;  %s1459_s17 = smov 4  }
   0xc   :  { %72 = dma.hbm_to_vmem [thread:$0]  %s65_s12, 2048, %s67_s13, [#allocation6], %s1458_s16, %s1458_s16, %s1459_s17  }
   0xd   :  { %s1460_s18 = smov [#allocation8]  }
   0xe   :  { %s80_s19 = sshll.u32 %s1460_s18, 4  ;;  %s81_s19 = int_to_ptr.vmem [resolvable:$true] %s80_s19 }
   0xf   :  { %83 = dma.hbm_to_vmem [thread:$0]  %s79_s5, 16, %s81_s19, [#allocation9]  }
  0x10   :  { %1445 = dma.done.wait [#allocation3], 4096  }
  0x11   :  { %1446 = vsyncadd [#allocation3], 4294963200 }
  0x12   :  { %1447 = dma.done.wait [#allocation6], 6144  }
  0x13   :  { %1448 = vsyncadd [#allocation6], 4294961152 }
  0x14   :  { %1449 = dma.done.wait [#allocation9], 16  }
  0x15   :  { %1450 = vsyncadd [#allocation9], 4294967280  ;;  %v105_v0 = vld [vmem:[%s1580_s3] sm:$0xff]  ;;  %v1232_v4 = vld [vmem:[%s1579_s2 + $0x4] sm:$0xf0]  ;;  %vm115_vm0 = vcmask 1043456  }
  0x16   :  { %v903_v1 = vld [vmem:[%s1579_s2] sm:$0xf]  ;;  %v107_v2 = vunpack.c.l.b16 %v105_v0  ;;  %v108_v3 = vunpack.c.h.b16 %v105_v0  ;;  %v1231_v5 = vld [vmem:[%s1579_s2 + $0x4] sm:$0xf]  ;;  %v905_v6 = vld [vmem:[%s1579_s2 + $0x8] sm:$0xf0] }
  0x17   :  { %vm111_vm1 = vcmask 64512   ;;  %v904_v7 = vor.u32 %v1232_v4, %v903_v1  ;;  %v969_v8 = vld [vmem:[#allocation2 + $0x70] sm:$0xf]  ;;  %v1248_v9 = vld [vmem:[#allocation2 + $0x74] sm:$0xf0]  ;;  %v908_v12 = vor.u32 %v1231_v5, %v905_v6  ;;  %vm158_vm2 = vcmask 130048  }
  0x18   :  { %v109_v10 = vpack.c.b16 %v107_v2, %v107_v2  ;;  %v110_v11 = vpack.c.b16 %v108_v3, %v108_v3  ;;  %v970_v13 = vor.u32 %v1248_v9, %v969_v8  ;;  %v1033_v14 = vld [vmem:[#allocation2 + $0xf0] sm:$0xf]  ;;  %v1264_v15 = vld [vmem:[#allocation2 + $0xf4] sm:$0xf0]  ;;  %v1247_v16 = vld [vmem:[#allocation2 + $0x74] sm:$0xf] }
  0x19   :  { %v104_v17 = vld [vmem:[%s1578_s1] sm:$0xf]  ;;  %v1034_v18 = vor.u32 %v1264_v15, %v1033_v14  ;;  %v971_v19 = vld [vmem:[#allocation2 + $0x78] sm:$0xf0]  ;;  %v1263_v20 = vld [vmem:[#allocation2 + $0xf4] sm:$0xf] }
  0x1a   :  { %v1035_v21 = vld [vmem:[#allocation2 + $0xf8] sm:$0xf0]  ;;  %v117_v22 = vsel %vm115_vm0, %v109_v10, 0  ;;  %v120_v23 = vsel %vm115_vm0, %v110_v11, 0  ;;  %402 = vmatpush.bf16.msra.mxu0 %v970_v13  ;;  %v961_v24 = vld [vmem:[#allocation2 + $0x60] sm:$0xf]  ;;  %v974_v26 = vor.u32 %v1247_v16, %v971_v19 }
  0x1b   :  { %v1246_v25 = vld [vmem:[#allocation2 + $0x64] sm:$0xf0]  ;;  %129 = vmatpush.bf16.msra.mxu2 %v117_v22  ;;  %142 = vmatpush.bf16.msra.mxu3 %v120_v23  ;;  %v1038_v27 = vor.u32 %v1263_v20, %v1035_v21  ;;  %v1025_v28 = vld [vmem:[#allocation2 + $0xe0] sm:$0xf]  ;;  %v1245_v30 = vld [vmem:[#allocation2 + $0x64] sm:$0xf] }
  0x1c   :  { %v1262_v29 = vld [vmem:[#allocation2 + $0xe4] sm:$0xf0]  ;;  %v962_v31 = vor.u32 %v1246_v25, %v961_v24  ;;  %v963_v32 = vld [vmem:[#allocation2 + $0x68] sm:$0xf0]  ;;  %v1261_v33 = vld [vmem:[#allocation2 + $0xe4] sm:$0xf]  ;;  %415 = vmatpush.bf16.msra.mxu1 %v1034_v18 }
  0x1d   :  { %v1027_v34 = vld [vmem:[#allocation2 + $0xe8] sm:$0xf0]  ;;  %v1026_v35 = vor.u32 %v1262_v29, %v1025_v28  ;;  %v966_v36 = vor.u32 %v1245_v30, %v963_v32  ;;  %v101_v38 = vld [vmem:[%s1577_s0] sm:$0xf]  ;;  %v953_v39 = vld [vmem:[#allocation2 + $0x50] sm:$0xf] }
  0x1e   :  { %899 = vmatmul.msk.bf16.vlgmr.msra.gmra.mxu2 %vm111_vm1, %v104_v17  ;;  %900 = vmatmul.msk.bf16.vlgmr.msra.gmra.mxu3 %vm111_vm1, %v104_v17  ;;  %v1030_v37 = vor.u32 %v1261_v33, %v1027_v34  ;;  %v1244_v40 = vld [vmem:[#allocation2 + $0x54] sm:$0xf0]  ;;  %v1017_v41 = vld [vmem:[#allocation2 + $0xd0] sm:$0xf]  ;;  %v1243_v44 = vld [vmem:[#allocation2 + $0x54] sm:$0xf] }
  0x1f   :  { %169 = vmatpush.bf16.msrb.mxu2 %v904_v7  ;;  %182 = vmatpush.bf16.msrb.mxu3 %v908_v12  ;;  %v954_v42 = vor.u32 %v1244_v40, %v953_v39  ;;  %v1260_v43 = vld [vmem:[#allocation2 + $0xd4] sm:$0xf0]  ;;  %v955_v45 = vld [vmem:[#allocation2 + $0x58] sm:$0xf0]  ;;  %v1259_v48 = vld [vmem:[#allocation2 + $0xd4] sm:$0xf] }
  0x20   :  { %403 = vmatpush.bf16.msra.mxu0 %v962_v31  ;;  %416 = vmatpush.bf16.msra.mxu1 %v1026_v35  ;;  %v1018_v46 = vor.u32 %v1260_v43, %v1017_v41  ;;  %v958_v47 = vor.u32 %v1243_v44, %v955_v45  ;;  %v1019_v49 = vld [vmem:[#allocation2 + $0xd8] sm:$0xf0]  ;;  %v945_v50 = vld [vmem:[#allocation2 + $0x40] sm:$0xf]  ;;  %v1242_v52 = vld [vmem:[#allocation2 + $0x44] sm:$0xf0] }
  0x21   :  { %v1022_v51 = vor.u32 %v1259_v48, %v1019_v49  ;;  %v1009_v53 = vld [vmem:[#allocation2 + $0xc0] sm:$0xf]  ;;  %v1258_v54 = vld [vmem:[#allocation2 + $0xc4] sm:$0xf0]  ;;  %v946_v55 = vor.u32 %v1242_v52, %v945_v50  ;;  %v1241_v57 = vld [vmem:[#allocation2 + $0x44] sm:$0xf] }
  0x22   :  { %v1010_v56 = vor.u32 %v1258_v54, %v1009_v53  ;;  %v947_v58 = vld [vmem:[#allocation2 + $0x48] sm:$0xf0]  ;;  %v1257_v59 = vld [vmem:[#allocation2 + $0xc4] sm:$0xf]  ;;  %v937_v63 = vld [vmem:[#allocation2 + $0x30] sm:$0xf] }
  0x23   :  { %428 = vmatpush.bf16.msra.mxu2 %v974_v26  ;;  %441 = vmatpush.bf16.msra.mxu3 %v1038_v27  ;;  %v950_v60 = vor.u32 %v1241_v57, %v947_v58  ;;  %v1011_v61 = vld [vmem:[#allocation2 + $0xc8] sm:$0xf0]  ;;  %v1240_v0 = vld [vmem:[#allocation2 + $0x34] sm:$0xf0]  ;;  %v1001_v1 = vld [vmem:[#allocation2 + $0xb0] sm:$0xf] }
  0x24   :  { %404 = vmatpush.bf16.msra.mxu0 %v954_v42  ;;  %417 = vmatpush.bf16.msra.mxu1 %v1018_v46  ;;  %v1014_v62 = vor.u32 %v1257_v59, %v1011_v61  ;;  %v938_v2 = vor.u32 %v1240_v0, %v937_v63  ;;  %v1256_v3 = vld [vmem:[#allocation2 + $0xb4] sm:$0xf0]  ;;  %v1239_v4 = vld [vmem:[#allocation2 + $0x34] sm:$0xf]  ;;  %v939_v5 = vld [vmem:[#allocation2 + $0x38] sm:$0xf0] }
  0x25   :  { %v1002_v6 = vor.u32 %v1256_v3, %v1001_v1  ;;  %v942_v7 = vor.u32 %v1239_v4, %v939_v5  ;;  %v1255_v8 = vld [vmem:[#allocation2 + $0xb4] sm:$0xf]  ;;  %v1003_v9 = vld [vmem:[#allocation2 + $0xb8] sm:$0xf0]  ;;  %v929_v10 = vld [vmem:[#allocation2 + $0x20] sm:$0xf] }
  0x26   :  { %v1006_v11 = vor.u32 %v1255_v8, %v1003_v9  ;;  %v1238_v12 = vld [vmem:[#allocation2 + $0x24] sm:$0xf0]  ;;  %v993_v13 = vld [vmem:[#allocation2 + $0xa0] sm:$0xf]  ;;  %v1237_v17 = vld [vmem:[#allocation2 + $0x24] sm:$0xf] }
  0x27   :  { %429 = vmatpush.bf16.msra.mxu2 %v966_v36  ;;  %442 = vmatpush.bf16.msra.mxu3 %v1030_v37  ;;  %v1254_v14 = vld [vmem:[#allocation2 + $0xa4] sm:$0xf0]  ;;  %v930_v15 = vor.u32 %v1238_v12, %v929_v10  ;;  %v931_v18 = vld [vmem:[#allocation2 + $0x28] sm:$0xf0]  ;;  %v1253_v19 = vld [vmem:[#allocation2 + $0xa4] sm:$0xf] }
  0x28   :  { %405 = vmatpush.bf16.msra.mxu0 %v946_v55  ;;  %418 = vmatpush.bf16.msra.mxu1 %v1010_v56  ;;  %v994_v16 = vor.u32 %v1254_v14, %v993_v13  ;;  %v934_v20 = vor.u32 %v1237_v17, %v931_v18  ;;  %v995_v21 = vld [vmem:[#allocation2 + $0xa8] sm:$0xf0]  ;;  %v921_v23 = vld [vmem:[#allocation2 + $0x10] sm:$0xf]  ;;  %v1236_v24 = vld [vmem:[#allocation2 + $0x14] sm:$0xf0] }
  0x29   :  { %v998_v22 = vor.u32 %v1253_v19, %v995_v21  ;;  %v922_v25 = vor.u32 %v1236_v24, %v921_v23  ;;  %v985_v26 = vld [vmem:[#allocation2 + $0x90] sm:$0xf]  ;;  %v1252_v27 = vld [vmem:[#allocation2 + $0x94] sm:$0xf0]  ;;  %v1235_v29 = vld [vmem:[#allocation2 + $0x14] sm:$0xf] }
  0x2a   :  { %v986_v28 = vor.u32 %v1252_v27, %v985_v26  ;;  %v923_v30 = vld [vmem:[#allocation2 + $0x18] sm:$0xf0]  ;;  %v1251_v31 = vld [vmem:[#allocation2 + $0x94] sm:$0xf]  ;;  %v913_v34 = vld [vmem:[#allocation2] sm:$0xf] }
  0x2b   :  { %430 = vmatpush.bf16.msra.mxu2 %v958_v47  ;;  %443 = vmatpush.bf16.msra.mxu3 %v1022_v51  ;;  %v926_v32 = vor.u32 %v1235_v29, %v923_v30  ;;  %v987_v33 = vld [vmem:[#allocation2 + $0x98] sm:$0xf0]  ;;  %v1234_v35 = vld [vmem:[#allocation2 + $0x4] sm:$0xf0]  ;;  %v1233_v40 = vld [vmem:[#allocation2 + $0x4] sm:$0xf] }
  0x2c   :  { %406 = vmatpush.bf16.msra.mxu0 %v938_v2  ;;  %419 = vmatpush.bf16.msra.mxu1 %v1002_v6  ;;  %v990_v36 = vor.u32 %v1251_v31, %v987_v33  ;;  %v914_v37 = vor.u32 %v1234_v35, %v913_v34  ;;  %v1250_v39 = vld [vmem:[#allocation2 + $0x84] sm:$0xf0]  ;;  %v915_v42 = vld [vmem:[#allocation2 + $0x8] sm:$0xf0]  ;;  %v1249_v43 = vld [vmem:[#allocation2 + $0x84] sm:$0xf] }
  0x2d   :  { %v979_v44 = vld [vmem:[#allocation2 + $0x88] sm:$0xf0]  ;;  %v918_v45 = vor.u32 %v1233_v40, %v915_v42  ;;  %v1097_v47 = vld [vmem:[#allocation5 + $0x70] sm:$0xf]  ;;  %v1280_v48 = vld [vmem:[#allocation5 + $0x74] sm:$0xf0] }
  0x2e   :  { %909 = vmatmul.msk.bf16.vlgmr.msrb.gmra.mxu2 %vm158_vm2, %v101_v38  ;;  %910 = vmatmul.msk.bf16.vlgmr.msrb.gmra.mxu3 %vm158_vm2, %v101_v38  ;;  %v977_v38 = vld [vmem:[#allocation2 + $0x80] sm:$0xf]  ;;  %v982_v46 = vor.u32 %v1249_v43, %v979_v44  ;;  %v1279_v49 = vld [vmem:[#allocation5 + $0x74] sm:$0xf]  ;;  %v1098_v50 = vor.u32 %v1280_v48, %v1097_v47  ;;  %v1099_v51 = vld [vmem:[#allocation5 + $0x78] sm:$0xf0] }
  0x2f   :  { %431 = vmatpush.bf16.msra.mxu2 %v950_v60  ;;  %444 = vmatpush.bf16.msra.mxu3 %v1014_v62  ;;  %v978_v41 = vor.u32 %v1250_v39, %v977_v38  ;;  %v1089_v52 = vld [vmem:[#allocation5 + $0x60] sm:$0xf]  ;;  %v1278_v53 = vld [vmem:[#allocation5 + $0x64] sm:$0xf0]  ;;  %v1102_v54 = vor.u32 %v1279_v49, %v1099_v51  ;;  %v1277_v55 = vld [vmem:[#allocation5 + $0x64] sm:$0xf] }
  0x30   :  { %407 = vmatpush.bf16.msra.mxu0 %v930_v15  ;;  %420 = vmatpush.bf16.msra.mxu1 %v994_v16  ;;  %v1091_v56 = vld [vmem:[#allocation5 + $0x68] sm:$0xf0]  ;;  %v1161_v57 = vld [vmem:[#allocation5 + $0xf0] sm:$0xf]  ;;  %v1090_v58 = vor.u32 %v1278_v53, %v1089_v52  ;;  %v1296_v59 = vld [vmem:[#allocation5 + $0xf4] sm:$0xf0] }
  0x31   :  { %v1295_v60 = vld [vmem:[#allocation5 + $0xf4] sm:$0xf]  ;;  %v1163_v61 = vld [vmem:[#allocation5 + $0xf8] sm:$0xf0]  ;;  %v1094_v62 = vor.u32 %v1277_v55, %v1091_v56  ;;  %v1162_v63 = vor.u32 %v1296_v59, %v1161_v57  ;;  %v1081_v1 = vld [vmem:[#allocation5 + $0x50] sm:$0xf] }
  0x32   :  { %v1166_v0 = vor.u32 %v1295_v60, %v1163_v61  ;;  %v1276_v2 = vld [vmem:[#allocation5 + $0x54] sm:$0xf0]  ;;  %v1275_v3 = vld [vmem:[#allocation5 + $0x54] sm:$0xf]  ;;  %v1083_v6 = vld [vmem:[#allocation5 + $0x58] sm:$0xf0] }
  0x33   :  { %432 = vmatpush.bf16.msra.mxu2 %v942_v7  ;;  %445 = vmatpush.bf16.msra.mxu3 %v1006_v11  ;;  %v1153_v7 = vld [vmem:[#allocation5 + $0xe0] sm:$0xf]  ;;  %v1294_v8 = vld [vmem:[#allocation5 + $0xe4] sm:$0xf0]  ;;  %v1293_v10 = vld [vmem:[#allocation5 + $0xe4] sm:$0xf]  ;;  %v1082_v12 = vor.u32 %v1276_v2, %v1081_v1  ;;  %v1086_v16 = vor.u32 %v1275_v3, %v1083_v6 }
  0x34   :  { %408 = vmatpush.bf16.msra.mxu0 %v922_v25  ;;  %421 = vmatpush.bf16.msra.mxu1 %v986_v28  ;;  %v1154_v9 = vor.u32 %v1294_v8, %v1153_v7  ;;  %v1155_v11 = vld [vmem:[#allocation5 + $0xe8] sm:$0xf0]  ;;  %v1073_v14 = vld [vmem:[#allocation5 + $0x40] sm:$0xf]  ;;  %v1274_v15 = vld [vmem:[#allocation5 + $0x44] sm:$0xf0] }
  0x35   :  { %v1158_v13 = vor.u32 %v1293_v10, %v1155_v11  ;;  %v1145_v17 = vld [vmem:[#allocation5 + $0xd0] sm:$0xf]  ;;  %v1292_v18 = vld [vmem:[#allocation5 + $0xd4] sm:$0xf0]  ;;  %v1291_v19 = vld [vmem:[#allocation5 + $0xd4] sm:$0xf]  ;;  %v1074_v26 = vor.u32 %v1274_v15, %v1073_v14 }
  0x36   :  { %v1075_v21 = vld [vmem:[#allocation5 + $0x48] sm:$0xf0]  ;;  %v1146_v23 = vor.u32 %v1292_v18, %v1145_v17  ;;  %v1137_v25 = vld [vmem:[#allocation5 + $0xc0] sm:$0xf]  ;;  %v1290_v27 = vld [vmem:[#allocation5 + $0xc4] sm:$0xf0] }
  0x37   :  { %433 = vmatpush.bf16.msra.mxu2 %v934_v20  ;;  %446 = vmatpush.bf16.msra.mxu3 %v998_v22  ;;  %v1273_v20 = vld [vmem:[#allocation5 + $0x44] sm:$0xf]  ;;  %v1147_v22 = vld [vmem:[#allocation5 + $0xd8] sm:$0xf0]  ;;  %v1139_v29 = vld [vmem:[#allocation5 + $0xc8] sm:$0xf0] }
  0x38   :  { %409 = vmatpush.bf16.msra.mxu0 %v914_v37  ;;  %422 = vmatpush.bf16.msra.mxu1 %v978_v41  ;;  %v1150_v24 = vor.u32 %v1291_v19, %v1147_v22  ;;  %v1289_v28 = vld [vmem:[#allocation5 + $0xc4] sm:$0xf]  ;;  %v1078_v30 = vor.u32 %v1273_v20, %v1075_v21  ;;  %v1065_v31 = vld [vmem:[#allocation5 + $0x30] sm:$0xf]  ;;  %v1271_v35 = vld [vmem:[#allocation5 + $0x34] sm:$0xf]  ;;  %v1138_v37 = vor.u32 %v1290_v27, %v1137_v25 }
  0x39   :  { %v1142_v38 = vor.u32 %v1289_v28, %v1139_v29  ;;  %v1057_v41 = vld [vmem:[#allocation5 + $0x20] sm:$0xf]  ;;  %v1270_v42 = vld [vmem:[#allocation5 + $0x24] sm:$0xf0]  ;;  %v1269_v44 = vld [vmem:[#allocation5 + $0x24] sm:$0xf] }
  0x3a   :  { %v188_v43 = vld [vmem:[%s1581_s4] sm:$0x3]  ;;  %v1288_v1 = vld [vmem:[#allocation5 + $0xb4] sm:$0xf0]  ;;  %v1287_v2 = vld [vmem:[#allocation5 + $0xb4] sm:$0xf] }
  0x3b   :  { %434 = vmatpush.bf16.msra.mxu2 %v926_v32  ;;  %447 = vmatpush.bf16.msra.mxu3 %v990_v36  ;;  %v1272_v32 = vld [vmem:[#allocation5 + $0x34] sm:$0xf0]  ;;  %v1067_v36 = vld [vmem:[#allocation5 + $0x38] sm:$0xf0]  ;;  %v190_v47 = vperm.slane %v188_v43, 0  ;;  %v191_v48 = vperm.slane %v188_v43, 1 }
  0x3c   :  { %660 = vmatpush.bf16.msrb.mxu0 %v1098_v50  ;;  %673 = vmatpush.bf16.msrb.mxu1 %v1162_v63  ;;  %v1066_v39 = vor.u32 %v1272_v32, %v1065_v31  ;;  %v1070_v40 = vor.u32 %v1271_v35, %v1067_v36  ;;  %v1049_v6 = vld [vmem:[#allocation5 + $0x10] sm:$0xf]  ;;  %v1268_v7 = vld [vmem:[#allocation5 + $0x14] sm:$0xf0]  ;;  %v1267_v8 = vld [vmem:[#allocation5 + $0x14] sm:$0xf] }
  0x3d   :  { %v1051_v10 = vld [vmem:[#allocation5 + $0x18] sm:$0xf0]  ;;  %v1285_v14 = vld [vmem:[#allocation5 + $0xa4] sm:$0xf]  ;;  %v1041_v18 = vld [vmem:[#allocation5] sm:$0xf] }
  0x3e   :  { %v1054_v11 = vor.u32 %v1267_v8, %v1051_v10  ;;  %v1266_v19 = vld [vmem:[#allocation5 + $0x4] sm:$0xf0]  ;;  %v1265_v21 = vld [vmem:[#allocation5 + $0x4] sm:$0xf]  ;;  %v1043_v22 = vld [vmem:[#allocation5 + $0x8] sm:$0xf0] }
  0x3f   :  { %435 = vmatpush.bf16.msra.mxu2 %v918_v45  ;;  %448 = vmatpush.bf16.msra.mxu3 %v982_v46  ;;  %v1059_v45 = vld [vmem:[#allocation5 + $0x28] sm:$0xf0]  ;;  %v1058_v46 = vor.u32 %v1270_v42, %v1057_v41  ;;  %v1042_v20 = vor.u32 %v1266_v19, %v1041_v18  ;;  %v1284_v25 = vld [vmem:[#allocation5 + $0x94] sm:$0xf0]  ;;  %v1115_v28 = vld [vmem:[#allocation5 + $0x98] sm:$0xf0] }
  0x40   :  { %661 = vmatpush.bf16.msrb.mxu0 %v1090_v58  ;;  %674 = vmatpush.bf16.msrb.mxu1 %v1154_v9  ;;  %v1062_v49 = vor.u32 %v1269_v44, %v1059_v45  ;;  %v1050_v9 = vor.u32 %v1268_v7, %v1049_v6  ;;  %v1282_v31 = vld [vmem:[#allocation5 + $0x84] sm:$0xf0]  ;;  %v1281_v32 = vld [vmem:[#allocation5 + $0x84] sm:$0xf]  ;;  %v1304_v36 = vld [vmem:[#allocation7 + $0x38] sm:$0xff]  ;;  %s887_s15 = sshll.u32 %s1588_s11, 4  ;;  %s888_s15 = int_to_ptr.hbm [resolvable:$true] %s887_s15 }
  0x41   :  { %v1310_v41 = vld [vmem:[#allocation7 + $0x68] sm:$0xff]  ;;  %v236_v42 = vld [vmem:[%s1583_s6] sm:$0x3]  ;;  %v1300_v45 = vld [vmem:[#allocation7 + $0x18] sm:$0xff] }
  0x42   :  { %v1301_v43 = vld [vmem:[#allocation7 + $0x20] sm:$0xff]  ;;  %v238_v44 = vperm.slane %v236_v42, 0  ;;  %v1306_v7 = vld [vmem:[#allocation7 + $0x48] sm:$0xff] }
  0x43   :  { %686 = vmatpush.bf16.msrb.mxu2 %v1102_v54  ;;  %699 = vmatpush.bf16.msrb.mxu3 %v1166_v0  ;;  %v1129_v0 = vld [vmem:[#allocation5 + $0xb0] sm:$0xf]  ;;  %v1297_v6 = vld [vmem:[#allocation7] sm:$0xff] }
  0x44   :  { %662 = vmatpush.bf16.msrb.mxu0 %v1082_v12  ;;  %675 = vmatpush.bf16.msrb.mxu1 %v1146_v23  ;;  %v1130_v3 = vor.u32 %v1288_v1, %v1129_v0  ;;  %v1121_v12 = vld [vmem:[#allocation5 + $0xa0] sm:$0xf]  ;;  %v1046_v23 = vor.u32 %v1265_v21, %v1043_v22 }
  0x45   :  { %v1309_v1 = vld [vmem:[#allocation7 + $0x60] sm:$0xff] }
  0x46   :  { %v1305_v8 = vld [vmem:[#allocation7 + $0x40] sm:$0xff] }
  0x47   :  { %687 = vmatpush.bf16.msrb.mxu2 %v1094_v62  ;;  %700 = vmatpush.bf16.msrb.mxu3 %v1158_v13  ;;  %v1286_v13 = vld [vmem:[#allocation5 + $0xa4] sm:$0xf0] }
  0x48   :  { %663 = vmatpush.bf16.msrb.mxu0 %v1074_v26  ;;  %676 = vmatpush.bf16.msrb.mxu1 %v1138_v37  ;;  %v1122_v15 = vor.u32 %v1286_v13, %v1121_v12  ;;  %v1283_v26 = vld [vmem:[#allocation5 + $0x94] sm:$0xf]  ;;  %v1312_v37 = vld [vmem:[#allocation7 + $0x78] sm:$0xff] }
  0x49   :  { %v1118_v29 = vor.u32 %v1283_v26, %v1115_v28 }
  0x4b   :  { %688 = vmatpush.bf16.msrb.mxu2 %v1086_v16  ;;  %701 = vmatpush.bf16.msrb.mxu3 %v1150_v24  ;;  %v1123_v16 = vld [vmem:[#allocation5 + $0xa8] sm:$0xf0]  ;;  %v1113_v24 = vld [vmem:[#allocation5 + $0x90] sm:$0xf] }
  0x4c   :  { %664 = vmatpush.bf16.msrb.mxu0 %v1066_v39  ;;  %677 = vmatpush.bf16.msrb.mxu1 %v1130_v3  ;;  %v1126_v17 = vor.u32 %v1285_v14, %v1123_v16  ;;  %v1114_v27 = vor.u32 %v1284_v25, %v1113_v24  ;;  %v1311_v39 = vld [vmem:[#allocation7 + $0x70] sm:$0xff]  ;;  %v1308_v3 = vld [vmem:[#allocation7 + $0x58] sm:$0xff] }
  0x4f   :  { %689 = vmatpush.bf16.msrb.mxu2 %v1078_v30  ;;  %702 = vmatpush.bf16.msrb.mxu3 %v1142_v38  ;;  %v1105_v30 = vld [vmem:[#allocation5 + $0x80] sm:$0xf]  ;;  %v1303_v38 = vld [vmem:[#allocation7 + $0x30] sm:$0xff] }
  0x50   :  { %665 = vmatpush.bf16.msrb.mxu0 %v1058_v46  ;;  %678 = vmatpush.bf16.msrb.mxu1 %v1122_v15 }
  0x53   :  { %690 = vmatpush.bf16.msrb.mxu2 %v1070_v40  ;;  %v1302_v40 = vld [vmem:[#allocation7 + $0x28] sm:$0xff] }
  0x54   :  { %666 = vmatpush.bf16.msrb.mxu0 %v1050_v9  ;;  %679 = vmatpush.bf16.msrb.mxu1 %v1114_v27  ;;  %v494_v9 = vld [vmem:[%s1585_s8] sm:$0x3]  ;;  %s1461_s8 = smov [#allocation10]  }
  0x55   :  { %v497_v16 = vperm.slane %v494_v9, 1  ;;  %s885_s7 = sshll.u32 %s1461_s8, 4  ;;  %s886_s7 = int_to_ptr.vmem [resolvable:$true] %s885_s7 }
  0x57   :  { %691 = vmatpush.bf16.msrb.mxu2 %v1062_v49 }
  0x58   :  { %667 = vmatpush.bf16.msrb.mxu0 %v1042_v20 }
  0x5b   :  { %692 = vmatpush.bf16.msrb.mxu2 %v1054_v11  ;;  %v496_v11 = vperm.slane %v494_v9, 0 }
  0x5f   :  { %693 = vmatpush.bf16.msrb.mxu2 %v1046_v23 }
  0xa1   :  { %v1559_v4 = vpop.f32.mrf.mxu2  ;;  %v1561_v5 = vpop.f32.mrf.mxu3 }
  0xa9   :  { %v133_v33 = vpop.f32.mrf.mxu2  ;;  %v146_v34 = vpop.f32.mrf.mxu3 }
  0xaa   :  { %v1106_v33 = vor.u32 %v1282_v31, %v1105_v30  ;;  %v1107_v34 = vld [vmem:[#allocation5 + $0x88] sm:$0xf0]  ;;  %v1322_v31 = vld [vmem:[#allocation8] ss:$0 sm:$0xff] }
  0xab   :  { %v1110_v35 = vor.u32 %v1281_v32, %v1107_v34 }
  0xac   :  { %680 = vmatpush.bf16.msrb.mxu1 %v1106_v33 }
  0xb1   :  { %v171_v50 = vpop.f32.mrf.mxu2  ;;  %v184_v51 = vpop.f32.mrf.mxu3 }
  0xb2   :  { %v172_v52 = vadd.f32 %v171_v50, %v1559_v4  ;;  %v185_v53 = vadd.f32 %v184_v51, %v1561_v5  ;;  %v1131_v4 = vld [vmem:[#allocation5 + $0xb8] sm:$0xf0]  ;;  %v239_v50 = vperm.slane %v236_v42, 1 }
  0xb3   :  { %v1134_v5 = vor.u32 %v1287_v2, %v1131_v4  ;;  %v1299_v2 = vld [vmem:[#allocation7 + $0x10] sm:$0xff]  ;;  %v1298_v4 = vld [vmem:[#allocation7 + $0x8] sm:$0xff] }
  0xb4   :  { %v194_v54 = vadd.f32 %v190_v47, %v172_v52  ;;  %v195_v55 = vadd.f32 %v191_v48, %v185_v53 }
  0xb5   :  { %703 = vmatpush.bf16.msrb.mxu3 %v1134_v5  ;;  %v1307_v5 = vld [vmem:[#allocation7 + $0x50] sm:$0xff] }
  0xb6   :  { %vm196_vm3 = vcmp.gt.f32.partialorder %v194_v54, 0.0  ;;  %v198_v56 = vmul.f32 0.01, %v194_v54  ;;  %vm197_vm4 = vcmp.gt.f32.partialorder %v195_v55, 0.0  ;;  %v199_v57 = vmul.f32 0.01, %v195_v55 }
  0xb8   :  { %v200_v58 = vsel %vm196_vm3, %v194_v54, %v198_v56  ;;  %v201_v59 = vsel %vm197_vm4, %v195_v55, %v199_v57 }
  0xb9   :  { %v173_v60 = vpop.f32.mrf.mxu2  ;;  %v186_v61 = vpop.f32.mrf.mxu3  ;;  %v202_v62 = vpack.c.bf16 %v200_v58, %v200_v58  ;;  %v203_v63 = vpack.c.bf16 %v201_v59, %v201_v59  ;;  %704 = vmatpush.bf16.msrb.mxu3 %v1126_v17 }
  0xbb   :  { %410 = vmatmul.bf16.vlgmr.msra.gmra.mxu0 %v202_v62  ;;  %423 = vmatmul.bf16.vlgmr.msra.gmra.mxu1 %v203_v63 }
  0xbc   :  { %436 = vmatmul.bf16.vlgmr.msra.gmra.mxu2 %v202_v62  ;;  %449 = vmatmul.bf16.vlgmr.msra.gmra.mxu3 %v203_v63 }
  0xbd   :  { %705 = vmatpush.bf16.msrb.mxu3 %v1118_v29  ;;  %852 = vmatpush.bf16.msra.mxu0 %v1304_v36 }
  0xbe   :  { %865 = vmatpush.bf16.msra.mxu1 %v1312_v37 }
  0xc1   :  { %706 = vmatpush.bf16.msrb.mxu3 %v1110_v35  ;;  %853 = vmatpush.bf16.msra.mxu0 %v1303_v38 }
  0xc2   :  { %866 = vmatpush.bf16.msra.mxu1 %v1311_v39 }
  0xc5   :  { %854 = vmatpush.bf16.msra.mxu0 %v1302_v40 }
  0xc6   :  { %867 = vmatpush.bf16.msra.mxu1 %v1310_v41 }
  0xc9   :  { %855 = vmatpush.bf16.msra.mxu0 %v1301_v43 }
  0xca   :  { %868 = vmatpush.bf16.msra.mxu1 %v1309_v1 }
  0xcd   :  { %856 = vmatpush.bf16.msra.mxu0 %v1300_v45 }
  0xce   :  { %869 = vmatpush.bf16.msra.mxu1 %v1308_v3 }
  0xd1   :  { %857 = vmatpush.bf16.msra.mxu0 %v1299_v2 }
  0xd2   :  { %870 = vmatpush.bf16.msra.mxu1 %v1307_v5 }
  0xd5   :  { %858 = vmatpush.bf16.msra.mxu0 %v1298_v4 }
  0xd6   :  { %871 = vmatpush.bf16.msra.mxu1 %v1306_v7 }
  0xd9   :  { %859 = vmatpush.bf16.msra.mxu0 %v1297_v6 }
  0xda   :  { %872 = vmatpush.bf16.msra.mxu1 %v1305_v8 }
 0x138   :  { %v411_v46 = vpop.f32.mrf.mxu0  ;;  %v424_v47 = vpop.f32.mrf.mxu1 }
 0x139   :  { %v412_v48 = vadd.f32 %v411_v46, %v238_v44 }
 0x13b   :  { %v425_v49 = vadd.f32 %v424_v47, %v412_v48 }
 0x13d   :  { %vm454_vm5 = vcmp.gt.f32.partialorder %v425_v49, 0.0  ;;  %v456_v51 = vmul.f32 0.01, %v425_v49 }
 0x13f   :  { %v437_v52 = vpop.f32.mrf.mxu2  ;;  %v450_v53 = vpop.f32.mrf.mxu3  ;;  %v458_v54 = vsel %vm454_vm5, %v425_v49, %v456_v51 }
 0x140   :  { %v438_v55 = vadd.f32 %v437_v52, %v239_v50  ;;  %v413_v56 = vpop.f32.mrf.mxu0  ;;  %v426_v57 = vpop.f32.mrf.mxu1  ;;  %v460_v58 = vpack.c.bf16 %v458_v54, %v458_v54 }
 0x142   :  { %v451_v59 = vadd.f32 %v450_v53, %v438_v55  ;;  %668 = vmatmul.bf16.vlgmr.msrb.gmra.mxu0 %v460_v58  ;;  %694 = vmatmul.bf16.vlgmr.msrb.gmra.mxu2 %v460_v58 }
 0x144   :  { %vm455_vm6 = vcmp.gt.f32.partialorder %v451_v59, 0.0  ;;  %v457_v60 = vmul.f32 0.01, %v451_v59 }
 0x146   :  { %v459_v61 = vsel %vm455_vm6, %v451_v59, %v457_v60 }
 0x147   :  { %v439_v62 = vpop.f32.mrf.mxu2  ;;  %v452_v63 = vpop.f32.mrf.mxu3  ;;  %v461_v0 = vpack.c.bf16 %v459_v61, %v459_v61 }
 0x149   :  { %681 = vmatmul.bf16.vlgmr.msrb.gmra.mxu1 %v461_v0  ;;  %707 = vmatmul.bf16.vlgmr.msrb.gmra.mxu3 %v461_v0 }
 0x1bf   :  { %v669_v10 = vpop.f32.mrf.mxu0 }
 0x1c0   :  { %v670_v12 = vadd.f32 %v669_v10, %v496_v11 }
 0x1c5   :  { %v695_v13 = vpop.f32.mrf.mxu2 }
 0x1c6   :  { %v682_v14 = vpop.f32.mrf.mxu1  ;;  %v696_v20 = vadd.f32 %v695_v13, %v497_v16 }
 0x1c7   :  { %v683_v15 = vadd.f32 %v682_v14, %v670_v12  ;;  %v671_v17 = vpop.f32.mrf.mxu0 }
 0x1c9   :  { %vm712_vm7 = vcmp.gt.f32.partialorder %v683_v15, 0.0  ;;  %v714_v18 = vmul.f32 0.01, %v683_v15 }
 0x1cb   :  { %v716_v19 = vsel %vm712_vm7, %v683_v15, %v714_v18 }
 0x1cc   :  { %v718_v21 = vpack.c.bf16 %v716_v19, %v716_v19  ;;  %v708_v22 = vpop.f32.mrf.mxu3 }
 0x1cd   :  { %v709_v23 = vadd.f32 %v708_v22, %v696_v20  ;;  %v697_v24 = vpop.f32.mrf.mxu2 }
 0x1ce   :  { %v684_v25 = vpop.f32.mrf.mxu1  ;;  %860 = vmatmul.bf16.vlgmr.msra.gmra.mxu0 %v718_v21 }
 0x1cf   :  { %vm713_vm8 = vcmp.gt.f32.partialorder %v709_v23, 0.0  ;;  %v715_v26 = vmul.f32 0.01, %v709_v23 }
 0x1d1   :  { %v717_v27 = vsel %vm713_vm8, %v709_v23, %v715_v26 }
 0x1d2   :  { %v719_v28 = vpack.c.bf16 %v717_v27, %v717_v27 }
 0x1d4   :  { %v710_v29 = vpop.f32.mrf.mxu3  ;;  %873 = vmatmul.bf16.vlgmr.msra.gmra.mxu1 %v719_v28 }
 0x24b   :  { %v861_v30 = vpop.f32.mrf.mxu0 }
 0x24c   :  { %v862_v32 = vadd.f32 %v1322_v31, %v861_v30 }
 0x251   :  { %v874_v33 = vpop.f32.mrf.mxu1 }
 0x252   :  { %v875_v34 = vadd.f32 %v874_v33, %v862_v32 }
 0x253   :  { %v863_v35 = vpop.f32.mrf.mxu0 }
 0x254   :  { %1323 = vtanh.f32 %v875_v34 }
 0x259   :  { %v876_v36 = vpop.f32.mrf.mxu1 }
 0x25a   :  { %v1324_v37 = vpop.eup %1323 }
 0x25b   :  { %879 = vst [vmem:[#allocation10] sm:$0xff] %v1324_v37 }
 0x25c   :  { %890 = dma.vmem_to_hbm [thread:$0]  %s886_s7, 128, %s888_s15, [#allocation4]  }
 0x25d   :  { %1451 = dma.done.wait [#allocation4], 128  }
 0x25e   :  { %1452 = vsyncadd [#allocation4], 4294967168 }
 0x25f   :  { %895 = vsyncpa [#allocation3], 1 }
 0x260   :  { %896 = vsyncpa [#allocation6], 1 }
 0x261   :  { %897 = vsyncpa [#allocation9], 1 }
 0x262   :  { %898 = vsyncpa [#allocation4], 1 }

</bundles_post_ra>
